<compile_context>
chip_gen: v7x
topology: tpu7x:2x2x1
jax: 0.10.0
libtpu: 0.0.40
codegen_flags: <defaults>
</compile_context>

<pallas_src>
import functools

import jax
import jax.numpy as jnp
from jax import lax
from jax.experimental import pallas as pl
from jax.experimental.pallas import tpu as pltpu


def _round_up(x: int, m: int) -> int:
    return ((x + m - 1) // m) * m


def _mlp_kernel(x_ref, w1_ref, b1_ref, w2_ref, b2_ref, o_ref):
    # x_ref : (TM, in_p)     compute dtype (f32 or bf16)
    # w1_ref: (in_p, in_p)   PyTorch (out, in) layout — NOT transposed
    # b1_ref: (1, in_p)      f32
    # w2_ref: (out_p, in_p)  PyTorch (out, in) layout
    # b2_ref: (1, out_p)     f32
    # o_ref : (TM, out_p)
    x = x_ref[...]

    # fc1: contract x's last dim against W1's last dim (weights stay (out, in)),
    # f32 accumulation on the MXU; bias folded in right after.
    h = lax.dot_general(
        x, w1_ref[...],
        dimension_numbers=(((1,), (1,)), ((), ())),
        preferred_element_type=jnp.float32,
    ) + b1_ref[...]

    # LeakyReLU(negative_slope=0.2), kept in f32 on the VPU (safe on v5e too).
    h = jnp.where(h >= 0, h, 0.2 * h)

    # fc2: same contracted-last-dim orientation, f32 accumulation.
    y = lax.dot_general(
        h.astype(w2_ref.dtype), w2_ref[...],
        dimension_numbers=(((1,), (1,)), ((), ())),
        preferred_element_type=jnp.float32,
    ) + b2_ref[...]

    o_ref[...] = y.astype(o_ref.dtype)


@functools.partial(jax.jit, static_argnames=("block_b", "compute_dtype"))
def mlp_forward(x, w1, b1, w2, b2, *, block_b=256, compute_dtype=jnp.float32):
    """Fused MLP forward.

    x : (B, in_dim)
    w1: (in_dim, in_dim)  PyTorch nn.Linear layout (out_features, in_features)
    b1: (in_dim,)
    w2: (out_dim, in_dim)
    b2: (out_dim,)

    block_b: batch tile (use 256 on v6e/v7x, 128 on v5e at production sizes).
    compute_dtype: dtype fed to the MXU (jnp.bfloat16 halves HBM/VMEM traffic
        and doubles MXU throughput; accumulation stays f32 either way).
    """
    B, in_dim = x.shape
    out_dim, in_dim2 = w2.shape
    assert w1.shape == (in_dim, in_dim) and in_dim2 == in_dim

    # Lane-dense padding: feature dims -> multiples of 128, batch -> tile multiple.
    in_p = _round_up(in_dim, 128)
    out_p = _round_up(out_dim, 128)
    tm = min(block_b, _round_up(B, 8))
    b_p = _round_up(B, tm)

    cd = compute_dtype
    # NOTE: in production, pad/cast the parameters ONCE at creation time instead
    # of per forward call; done here so arbitrary (small) shapes work.
    x_p = jnp.zeros((b_p, in_p), cd).at[:B, :in_dim].set(x.astype(cd))
    w1_p = jnp.zeros((in_p, in_p), cd).at[:in_dim, :in_dim].set(w1.astype(cd))
    w2_p = jnp.zeros((out_p, in_p), cd).at[:out_dim, :in_dim].set(w2.astype(cd))
    b1_p = jnp.zeros((1, in_p), jnp.float32).at[0, :in_dim].set(b1.astype(jnp.float32))
    b2_p = jnp.zeros((1, out_p), jnp.float32).at[0, :out_dim].set(b2.astype(jnp.float32))

    grid = (b_p // tm,)

    # Constant index_map -> block never changes across the grid -> Pallas keeps
    # weights/biases resident in VMEM instead of re-DMAing them per batch tile.
    resident = lambda shape: pl.BlockSpec(shape, lambda i: (0,) * len(shape))

    out = pl.pallas_call(
        _mlp_kernel,
        out_shape=jax.ShapeDtypeStruct((b_p, out_p), x.dtype),
        grid=grid,
        in_specs=[
            pl.BlockSpec((tm, in_p), lambda i: (i, 0)),   # x: pipelined over batch
            resident((in_p, in_p)),                        # W1 resident
            resident((1, in_p)),                           # b1 resident
            resident((out_p, in_p)),                       # W2 resident
            resident((1, out_p)),                          # b2 resident
        ],
        out_specs=pl.BlockSpec((tm, out_p), lambda i: (i, 0)),
        compiler_params=pltpu.CompilerParams(
            # batch tiles are independent -> shard across TensorCores (v7x).
            dimension_semantics=("parallel",),
            # 48 MiB: plenty for resident weights at these sizes, still leaves
            # headroom under v7x's 64 MiB physical VMEM.
            vmem_limit_bytes=48 << 20,
        ),
    )(x_p, w1_p, b1_p, w2_p, b2_p)

    return out[:B, :out_dim]


def _torch_like_linear_init(key, out_features, in_features):
    """Deterministic init mimicking nn.Linear default (uniform(-k, k), k=1/sqrt(fan_in))."""
    kw, kb = jax.random.split(key)
    bound = 1.0 / jnp.sqrt(in_features)
    w = jax.random.uniform(kw, (out_features, in_features), jnp.float32, -bound, bound)
    b = jax.random.uniform(kb, (out_features,), jnp.float32, -bound, bound)
    return w, b


if __name__ == "__main__":
    key = jax.random.PRNGKey(0)
    k_x, k_fc1, k_fc2 = jax.random.split(key, 3)

    B, in_dim, out_dim = 8, 32, 16

    x = jax.random.normal(k_x, (B, in_dim), jnp.float32)
    w1, b1 = _torch_like_linear_init(k_fc1, in_dim, in_dim)   # fc1: in_dim -> in_dim
    w2, b2 = _torch_like_linear_init(k_fc2, out_dim, in_dim)  # fc2: in_dim -> out_dim

    # --- f32 path: bit-tight check against pure-JAX reference ---
    y = mlp_forward(x, w1, b1, w2, b2, compute_dtype=jnp.float32)
    jax.block_until_ready(y)
    assert y.shape == (B, out_dim)

    h_ref = x @ w1.T + b1
    h_ref = jnp.where(h_ref >= 0, h_ref, 0.2 * h_ref)
    y_ref = h_ref @ w2.T + b2
    assert jnp.allclose(y, y_ref, atol=1e-5, rtol=1e-5), "f32 mismatch vs reference"

    # --- bf16-in / f32-accumulate path (production dtype) ---
    y_bf16 = mlp_forward(x, w1, b1, w2, b2, compute_dtype=jnp.bfloat16)
    jax.block_until_ready(y_bf16)

    xb, w1b, w2b = (a.astype(jnp.bfloat16) for a in (x, w1, w2))
    hb = jnp.dot(xb, w1b.T, preferred_element_type=jnp.float32) + b1
    hb = jnp.where(hb >= 0, hb, 0.2 * hb)
    yb_ref = jnp.dot(hb.astype(jnp.bfloat16), w2b.T,
                     preferred_element_type=jnp.float32) + b2
    assert jnp.allclose(y_bf16, yb_ref, atol=3e-2, rtol=3e-2), "bf16 mismatch vs reference"

    print("KERNEL_OK")
</pallas_src>

<mosaic_0001>
module attributes {stable_mosaic.version = 11 : i64} {
  func.func @_mlp_kernel(%arg0: i32, %arg1: memref<8x128xf32, #tpu.memory_space<vmem>>, %arg2: memref<128x128xf32, #tpu.memory_space<vmem>>, %arg3: memref<1x128xf32, #tpu.memory_space<vmem>>, %arg4: memref<128x128xf32, #tpu.memory_space<vmem>>, %arg5: memref<1x128xf32, #tpu.memory_space<vmem>>, %arg6: memref<8x128xf32, #tpu.memory_space<vmem>>) attributes {dimension_semantics = [#tpu.dimension_semantics<parallel>], iteration_bounds = array<i64: 1>, scalar_prefetch = 0 : i64, scratch_operands = 0 : i64, tpu.core_type = #tpu.core_type<tc>, window_params = [{transform_indices = @transform_0, window_bounds = array<i64: 8, 128>}, {pipeline_mode = #tpu.pipeline_mode<synchronous>, transform_indices = @transform_1, window_bounds = array<i64: 128, 128>}, {pipeline_mode = #tpu.pipeline_mode<synchronous>, transform_indices = @transform_2, window_bounds = array<i64: 1, 128>}, {pipeline_mode = #tpu.pipeline_mode<synchronous>, transform_indices = @transform_3, window_bounds = array<i64: 128, 128>}, {pipeline_mode = #tpu.pipeline_mode<synchronous>, transform_indices = @transform_4, window_bounds = array<i64: 1, 128>}, {transform_indices = @transform_5, window_bounds = array<i64: 8, 128>}]} {
    %c0 = arith.constant 0 : index
    %c0_0 = arith.constant 0 : index
    %0 = vector.load %arg1[%c0, %c0_0] : memref<8x128xf32, #tpu.memory_space<vmem>>, vector<8x128xf32>
    %c0_1 = arith.constant 0 : index
    %c0_2 = arith.constant 0 : index
    %1 = vector.load %arg2[%c0_1, %c0_2] : memref<128x128xf32, #tpu.memory_space<vmem>>, vector<128x128xf32>
    %cst = arith.constant dense<0.000000e+00> : vector<8x128xf32>
    %2 = tpu.matmul %0, %1, %cst {dimension_numbers = #tpu.dot_dimension_numbers<[1], [1], [0], [0], [0, 0, 1, 0], [], []>} : vector<8x128xf32>, vector<128x128xf32>, vector<8x128xf32> -> vector<8x128xf32>
    %c0_3 = arith.constant 0 : index
    %c0_4 = arith.constant 0 : index
    %3 = vector.load %arg3[%c0_3, %c0_4] : memref<1x128xf32, #tpu.memory_space<vmem>>, vector<1x128xf32>
    %4 = vector.broadcast %3 : vector<1x128xf32> to vector<8x128xf32>
    %5 = arith.addf %2, %4 : vector<8x128xf32>
    %cst_5 = arith.constant 0.000000e+00 : f32
    %6 = vector.broadcast %cst_5 : f32 to vector<8x128xf32>
    %7 = arith.cmpf oge, %5, %6 : vector<8x128xf32>
    %cst_6 = arith.constant 2.000000e-01 : f32
    %8 = vector.broadcast %cst_6 : f32 to vector<8x128xf32>
    %9 = arith.mulf %8, %5 : vector<8x128xf32>
    %10 = arith.select %7, %5, %9 : vector<8x128xi1>, vector<8x128xf32>
    %c0_7 = arith.constant 0 : index
    %c0_8 = arith.constant 0 : index
    %11 = vector.load %arg4[%c0_7, %c0_8] : memref<128x128xf32, #tpu.memory_space<vmem>>, vector<128x128xf32>
    %cst_9 = arith.constant dense<0.000000e+00> : vector<8x128xf32>
    %12 = tpu.matmul %10, %11, %cst_9 {dimension_numbers = #tpu.dot_dimension_numbers<[1], [1], [0], [0], [0, 0, 1, 0], [], []>} : vector<8x128xf32>, vector<128x128xf32>, vector<8x128xf32> -> vector<8x128xf32>
    %c0_10 = arith.constant 0 : index
    %c0_11 = arith.constant 0 : index
    %13 = vector.load %arg5[%c0_10, %c0_11] : memref<1x128xf32, #tpu.memory_space<vmem>>, vector<1x128xf32>
    %14 = vector.broadcast %13 : vector<1x128xf32> to vector<8x128xf32>
    %15 = arith.addf %12, %14 : vector<8x128xf32>
    %c0_12 = arith.constant 0 : index
    %c0_13 = arith.constant 0 : index
    %16 = vector.load %arg6[%c0_12, %c0_13] : memref<8x128xf32, #tpu.memory_space<vmem>>, vector<8x128xf32>
    tpu.vector_store %arg6[%c0_12, %c0_13], %15 {strides = array<i32>} : memref<8x128xf32, #tpu.memory_space<vmem>>, vector<8x128xf32>,
    return
  }
  func.func @transform_0(%arg0: i32) -> (i32, i32) {
    %c0_i32 = arith.constant 0 : i32
    %c0_i32_0 = arith.constant 0 : i32
    return %arg0, %c0_i32 : i32, i32
  }
  func.func @transform_1(%arg0: i32) -> (i32, i32) {
    %c0_i32 = arith.constant 0 : i32
    %c0_i32_0 = arith.constant 0 : i32
    %c0_i32_1 = arith.constant 0 : i32
    return %c0_i32, %c0_i32_0 : i32, i32
  }
  func.func @transform_2(%arg0: i32) -> (i32, i32) {
    %c0_i32 = arith.constant 0 : i32
    %c0_i32_0 = arith.constant 0 : i32
    %c0_i32_1 = arith.constant 0 : i32
    return %c0_i32, %c0_i32_0 : i32, i32
  }
  func.func @transform_3(%arg0: i32) -> (i32, i32) {
    %c0_i32 = arith.constant 0 : i32
    %c0_i32_0 = arith.constant 0 : i32
    %c0_i32_1 = arith.constant 0 : i32
    return %c0_i32, %c0_i32_0 : i32, i32
  }
  func.func @transform_4(%arg0: i32) -> (i32, i32) {
    %c0_i32 = arith.constant 0 : i32
    %c0_i32_0 = arith.constant 0 : i32
    %c0_i32_1 = arith.constant 0 : i32
    return %c0_i32, %c0_i32_0 : i32, i32
  }
  func.func @transform_5(%arg0: i32) -> (i32, i32) {
    %c0_i32 = arith.constant 0 : i32
    %c0_i32_0 = arith.constant 0 : i32
    return %arg0, %c0_i32 : i32, i32
  }
}

</mosaic_0001>

<bundles_post_ra>
// kernel: mlp_forward.1
= control target key start
LH: loop header
LB: loop body
LE: loop exit
PB: predicated region body
PF: predicated region fallthrough
CT: control target
= control target key end

     0   :  { %v408_v2 = vmov 0.0|0.0   ;;  %vm409_vm0 = vmmov 0   ;;  %v410_v4 = vmov 0.0   ;;  %s575_s0 = inlined_call_operand.vmem [shape: f32[8,128], index: 0, kind: input, shape index: {}]   ;;  %s576_s1 = inlined_call_operand.vmem [shape: f32[128,128], index: 1, kind: input, shape index: {}]   ;;  %s577_s2 = inlined_call_operand.vmem [shape: f32[1,128], index: 2, kind: input, shape index: {}]   ;;  %s578_s3 = inlined_call_operand.vmem [shape: f32[128,128], index: 3, kind: input, shape index: {}]   ;;  %s579_s4 = inlined_call_operand.vmem [shape: f32[1,128], index: 4, kind: input, shape index: {}]   ;;  %s580_s5 = inlined_call_operand.hbm [shape: f32[8,128], index: 5, kind: output, shape index: {}]  }
   0x1   :  { %v22_v0 = vld [vmem:[%s576_s1] sm:$0xff]  ;;  %v23_v1 = vld [vmem:[%s576_s1 + $0x8] sm:$0xff]  ;;  %332 = vmatprep.subr.bf16.mxu0 %v408_v2  ;;  %294 = vmatprep.mubr.msk.f32.mxu0 %vm409_vm0, %v410_v4  ;;  %v24_v5 = vld [vmem:[%s576_s1 + $0x10] sm:$0xff] }
   0x2   :  { %v333_v3 = vpack.c.bf16 %v23_v1, %v22_v0  ;;  %356 = vmatprep.subr.bf16.mxu1 %v408_v2  ;;  %329 = vmatprep.mubr.msk.f32.mxu1 %vm409_vm0, %v410_v4  ;;  %v25_v6 = vld [vmem:[%s576_s1 + $0x18] sm:$0xff]  ;;  %v118_v7 = vld [vmem:[%s578_s3] sm:$0xff]  ;;  %v119_v8 = vld [vmem:[%s578_s3 + $0x8] sm:$0xff] }
   0x3   :  { %v336_v9 = vpack.c.bf16 %v25_v6, %v24_v5  ;;  %v357_v10 = vpack.c.bf16 %v119_v8, %v118_v7  ;;  %v120_v11 = vld [vmem:[%s578_s3 + $0x10] sm:$0xff]  ;;  %v121_v12 = vld [vmem:[%s578_s3 + $0x18] sm:$0xff] }
   0x4   :  { %334 = vmatpush3.bf16.xpose.msra.mxu0 %v333_v3 }
   0x5   :  { %335 = vmatprep.subr.bf16.mxu0 %v408_v2  ;;  %358 = vmatpush3.bf16.xpose.msra.mxu1 %v357_v10 }
   0x6   :  { %359 = vmatprep.subr.bf16.mxu1 %v408_v2 }
   0xc   :  { %337 = vmatpush3.bf16.xpose.msra.mxu0 %v336_v9 }
   0xd   :  { %10 = vsyncpa [#allocation3], 0  ;;  %338 = vmatprep.subr.bf16.mxu0 %v408_v2  ;;  %v26_v13 = vld [vmem:[%s576_s1 + $0x20] sm:$0xff]  ;;  %v27_v14 = vld [vmem:[%s576_s1 + $0x28] sm:$0xff]  ;;  %v360_v15 = vpack.c.bf16 %v121_v12, %v120_v11  ;;  %s411_s11 = smov [#allocation2]  }
   0xe   :  { %v339_v16 = vpack.c.bf16 %v27_v14, %v26_v13  ;;  %v122_v17 = vld [vmem:[%s578_s3 + $0x20] sm:$0xff]  ;;  %v123_v18 = vld [vmem:[%s578_s3 + $0x28] sm:$0xff]  ;;  %v28_v19 = vld [vmem:[%s576_s1 + $0x30] sm:$0xff]  ;;  %s218_s12 = sshll.u32 %s411_s11, 4  ;;  %s219_s12 = int_to_ptr.vmem [resolvable:$true] %s218_s12 }
   0xf   :  { %361 = vmatpush3.bf16.xpose.msra.mxu1 %v360_v15  ;;  %v29_v20 = vld [vmem:[%s576_s1 + $0x38] sm:$0xff]  ;;  %v363_v21 = vpack.c.bf16 %v123_v18, %v122_v17  ;;  %v124_v23 = vld [vmem:[%s578_s3 + $0x30] sm:$0xff]  ;;  %v30_v25 = vld [vmem:[%s576_s1 + $0x40] sm:$0xff]  ;;  %p389_p1 = scmp.lt.s32.totalorder %s219_s12, %s219_s12 }
  0x10   :  { %362 = vmatprep.subr.bf16.mxu1 %v408_v2  ;;  %v342_v22 = vpack.c.bf16 %v29_v20, %v28_v19  ;;  %v125_v24 = vld [vmem:[%s578_s3 + $0x38] sm:$0xff]  ;;  %v31_v26 = vld [vmem:[%s576_s1 + $0x48] sm:$0xff]  ;;  %v126_v29 = vld [vmem:[%s578_s3 + $0x40] sm:$0xff] }
  0x11   :  { %v366_v27 = vpack.c.bf16 %v125_v24, %v124_v23  ;;  %v345_v28 = vpack.c.bf16 %v31_v26, %v30_v25  ;;  %v127_v30 = vld [vmem:[%s578_s3 + $0x48] sm:$0xff]  ;;  %v32_v31 = vld [vmem:[%s576_s1 + $0x50] sm:$0xff]  ;;  %v33_v32 = vld [vmem:[%s576_s1 + $0x58] sm:$0xff] }
  0x12   :  { %v369_v33 = vpack.c.bf16 %v127_v30, %v126_v29  ;;  %v348_v34 = vpack.c.bf16 %v33_v32, %v32_v31  ;;  %v128_v35 = vld [vmem:[%s578_s3 + $0x50] sm:$0xff]  ;;  %v129_v36 = vld [vmem:[%s578_s3 + $0x58] sm:$0xff]  ;;  %v34_v37 = vld [vmem:[%s576_s1 + $0x60] sm:$0xff] }
  0x13   :  { %v35_v38 = vld [vmem:[%s576_s1 + $0x68] sm:$0xff]  ;;  %v372_v39 = vpack.c.bf16 %v129_v36, %v128_v35  ;;  %v130_v41 = vld [vmem:[%s578_s3 + $0x60] sm:$0xff]  ;;  %v36_v43 = vld [vmem:[%s576_s1 + $0x70] sm:$0xff] }
  0x14   :  { %340 = vmatpush3.bf16.xpose.msra.mxu0 %v339_v16  ;;  %v351_v40 = vpack.c.bf16 %v35_v38, %v34_v37  ;;  %v131_v42 = vld [vmem:[%s578_s3 + $0x68] sm:$0xff]  ;;  %v37_v44 = vld [vmem:[%s576_s1 + $0x78] sm:$0xff]  ;;  %v132_v47 = vld [vmem:[%s578_s3 + $0x70] sm:$0xff] }
  0x15   :  { %341 = vmatprep.subr.bf16.mxu0 %v408_v2  ;;  %v375_v45 = vpack.c.bf16 %v131_v42, %v130_v41  ;;  %v354_v46 = vpack.c.bf16 %v37_v44, %v36_v43  ;;  %v133_v48 = vld [vmem:[%s578_s3 + $0x78] sm:$0xff]  ;;  %v21_v50 = vld [vmem:[%s575_s0] sm:$0xff]  ;;  %s384_s0 = scalar_lea.vmem %s219_s12, 128 }
  0x16   :  { %v378_v49 = vpack.c.bf16 %v133_v48, %v132_v47  ;;  %v226_v51 = vld [vmem:[%s577_s2] ss:$0 sm:$0xff]  ;;  %p385_p0 = scmp.ne.s32.totalorder %s219_s12, %s384_s0  ;;  %p390_p2 = scmp.lt.s32.totalorder %s384_s0, %s384_s0 }
  0x17   :  { %364 = vmatpush3.bf16.xpose.msra.mxu1 %v363_v21  ;;  %v227_v57 = vld [vmem:[%s579_s4] ss:$0 sm:$0xff] }
  0x18   :  { %365 = vmatprep.subr.bf16.mxu1 %v408_v2  ;;  %p391_p3 = por %p390_p2, %p389_p1 }
  0x1a   :  { %p392_p4 = pnand %p391_p3, %p385_p0 }
  0x1c   :  { %343 = vmatpush3.bf16.xpose.msra.mxu0 %v342_v22 }
  0x1d   :  { %344 = vmatprep.subr.bf16.mxu0 %v408_v2 }
  0x1f   :  { %367 = vmatpush3.bf16.xpose.msra.mxu1 %v366_v27 }
  0x20   :  { %368 = vmatprep.subr.bf16.mxu1 %v408_v2 }
  0x24   :  { %346 = vmatpush3.bf16.xpose.msra.mxu0 %v345_v28 }
  0x25   :  { %347 = vmatprep.subr.bf16.mxu0 %v408_v2 }
  0x27   :  { %370 = vmatpush3.bf16.xpose.msra.mxu1 %v369_v33 }
  0x28   :  { %371 = vmatprep.subr.bf16.mxu1 %v408_v2 }
  0x2c   :  { %349 = vmatpush3.bf16.xpose.msra.mxu0 %v348_v34 }
  0x2d   :  { %350 = vmatprep.subr.bf16.mxu0 %v408_v2 }
  0x2f   :  { %373 = vmatpush3.bf16.xpose.msra.mxu1 %v372_v39 }
  0x30   :  { %374 = vmatprep.subr.bf16.mxu1 %v408_v2 }
  0x34   :  { %352 = vmatpush3.bf16.xpose.msra.mxu0 %v351_v40 }
  0x35   :  { %353 = vmatprep.subr.bf16.mxu0 %v408_v2 }
  0x37   :  { %376 = vmatpush3.bf16.xpose.msra.mxu1 %v375_v45 }
  0x38   :  { %377 = vmatprep.subr.bf16.mxu1 %v408_v2 }
  0x3c   :  { %355 = vmatpush3.bf16.xpose.msra.mxu0 %v354_v46 }
  0x3f   :  { %379 = vmatpush3.bf16.xpose.msra.mxu1 %v378_v49 }
  0x43   :  { %295 = vmatmul.mubr.f32.vlgmr.msra.gmra.mrb[0].mxu0 %v21_v50 }
 0x116   :  { %v111_v52 = vpop.f32.mrb[0].mxu0 }
 0x117   :  { %v112_v53 = vadd.f32 %v226_v51, %v111_v52  ;;  %v296_v54 = vpop.f32.mrb[1].mxu0 }
 0x119   :  { %v116_v55 = vmul.f32 0.2, %v112_v53  ;;  %vm115_vm1 = vcmp.ge.f32.partialorder %v112_v53, 0.0 }
 0x11b   :  { %v117_v56 = vsel %vm115_vm1, %v112_v53, %v116_v55 }
 0x11c   :  { %330 = vmatmul.mubr.f32.vlgmr.msra.gmra.mrb[0].mxu1 %v117_v56 }
 0x1ef   :  { %v207_v58 = vpop.f32.mrb[0].mxu1 }
 0x1f0   :  { %v208_v59 = vadd.f32 %v227_v57, %v207_v58  ;;  %v331_v60 = vpop.f32.mrb[1].mxu1 }
 0x1f2   :  { %211 = vst [vmem:[#allocation2] sm:$0xff] %v208_v59 }
 0x1f3   :  { %395 = shalt.err (!%p392_p4)
}
 0x1f4   :  { %s396_s14 = scalar_lea.hbm %s580_s5, 128 }
 0x1f5   :  { %p397_p5 = scmp.ne.s32.totalorder %s580_s5, %s396_s14  ;;  %p400_p6 = scmp.lt.u32.totalorder %s396_s14, %s580_s5 }
 0x1f7   :  { %p402_p7 = pnand %p400_p6, %p397_p5 }
 0x1f9   :  { %405 = shalt.err (!%p402_p7)
}
 0x1fa   :  { %221 = dma.vmem_to_hbm [thread:$0]  %s219_s12, 128, %s580_s5, [#allocation3]  }
 0x1fb   :  { %406 = dma.done.wait [#allocation3], 128  }
 0x1fc   :  { %407 = vsyncadd [#allocation3], 4294967168 }
 0x1fd   :  { %225 = vsyncpa [#allocation3], 1 }

</bundles_post_ra>
